<compile_context>
chip_gen: v5e
topology: v5e:2x2
jax: 0.10.0
libtpu: 0.0.40
codegen_flags: <defaults>
</compile_context>

<pallas_src>
import math

import jax
import jax.numpy as jnp
from jax import lax
from jax.experimental import pallas as pl
from jax.experimental.pallas import tpu as pltpu


def _round_up(x, m):
    return (x + m - 1) // m * m


# ---------------------------------------------------------------------------
# Pallas kernel: gather a tile of embedding rows via one-hot @ table (MXU).
# ---------------------------------------------------------------------------
def _embed_gather_kernel(ids_ref, emb_ref, o_ref):
    ids = ids_ref[...]                                    # (tm, 1) int32
    tm = ids.shape[0]
    v_pad = emb_ref.shape[0]
    iota = lax.broadcasted_iota(jnp.int32, (tm, v_pad), 1)
    onehot = (iota == ids).astype(emb_ref.dtype)          # exact 0/1 rows
    # Exact gather: one 1.0 per row, everything else contributes exact zeros.
    o_ref[...] = jnp.dot(onehot, emb_ref[...],
                         preferred_element_type=jnp.float32).astype(o_ref.dtype)


def positional_embedder_forward(tokens, emb, *, tm_max=512):
    """tokens: [B, L] int, emb: [V, D] float -> [B, L, D] float (== emb[tokens])."""
    B, L = tokens.shape
    V, D = emb.shape
    M = B * L

    # Lane/sublane-aligned table: rows (contraction dim) and cols (lane dim)
    # both padded to multiples of 128. Padded rows/cols are never selected /
    # are sliced off afterwards.
    v_pad = _round_up(V, 128)
    d_pad = _round_up(D, 128)
    emb_p = emb
    if (v_pad, d_pad) != (V, D):
        emb_p = jnp.pad(emb, ((0, v_pad - V), (0, d_pad - D)))
    # TODO(synk): for very large num_possible_tokens the padded table will not
    # fit VMEM; that regime needs a manual per-row DMA gather (memory_space=pl.ANY).

    # Tile the flattened token axis. Expose >= 2 tiles when possible so the
    # "parallel" axis can shard across v7x's two TensorCores.
    m_align = _round_up(max(M, 1), 8)
    if m_align <= tm_max:
        tm = _round_up(-(-M // 2), 8) if m_align >= 16 else m_align
    else:
        tm = tm_max
    m_pad = _round_up(max(M, 1), tm)

    ids = tokens.reshape(M).astype(jnp.int32)
    if m_pad != M:
        ids = jnp.pad(ids, (0, m_pad - M))                # pad rows gather row 0
    ids2d = ids.reshape(m_pad, 1)

    out = pl.pallas_call(
        _embed_gather_kernel,
        out_shape=jax.ShapeDtypeStruct((m_pad, d_pad), jnp.float32),
        grid_spec=pltpu.PrefetchScalarGridSpec(
            num_scalar_prefetch=0,
            grid=(m_pad // tm,),
            in_specs=[
                pl.BlockSpec((tm, 1), lambda i: (i, 0)),          # token-id tile
                pl.BlockSpec((v_pad, d_pad), lambda i: (0, 0)),   # table, resident
            ],
            out_specs=pl.BlockSpec((tm, d_pad), lambda i: (i, 0)),
        ),
        compiler_params=pltpu.CompilerParams(
            dimension_semantics=("parallel",)),
    )(ids2d, emb_p)

    return out[:M, :D].reshape(B, L, D)


# ---------------------------------------------------------------------------
# Sinusoidal table identical to the PyTorch positional_embeding_matrix.
# ---------------------------------------------------------------------------
def positional_embedding_matrix(num_positions, d_out):
    assert d_out % 2 == 0, f"d_out should be even, got {d_out}"
    position = jnp.arange(num_positions, dtype=jnp.float32)[:, None]
    div_term = jnp.exp(jnp.arange(0, d_out, 2, dtype=jnp.float32)
                       * (-math.log(10000.0) / d_out))
    angles = position * div_term                          # (P, d_out // 2)
    pe = jnp.zeros((num_positions, d_out), jnp.float32)
    pe = pe.at[:, 0::2].set(jnp.sin(angles))
    pe = pe.at[:, 1::2].set(jnp.cos(angles))
    return pe


if __name__ == "__main__":
    key = jax.random.PRNGKey(0)
    B, L = 2, 16
    num_possible_tokens, d_embed = 512, 128

    emb = positional_embedding_matrix(num_possible_tokens, d_embed)
    tokens = jax.random.randint(key, (B, L), 0, num_possible_tokens,
                                dtype=jnp.int32)

    out = jax.jit(positional_embedder_forward)(tokens, emb)
    out = jax.block_until_ready(out)

    ref = emb[tokens]                                     # exact gather reference
    assert out.shape == ref.shape == (B, L, d_embed), (out.shape, ref.shape)
    err = float(jnp.max(jnp.abs(out - ref)))
    assert err < 1e-5, f"max abs error {err}"
    print("KERNEL_OK")
</pallas_src>

<mosaic_0001>
module attributes {stable_mosaic.version = 11 : i64} {
  func.func @_embed_gather_kernel(%arg0: i32, %arg1: memref<16x1xi32, #tpu.memory_space<vmem>>, %arg2: memref<512x128xf32, #tpu.memory_space<vmem>>, %arg3: memref<16x128xf32, #tpu.memory_space<vmem>>) attributes {dimension_semantics = [#tpu.dimension_semantics<parallel>], iteration_bounds = array<i64: 2>, scalar_prefetch = 0 : i64, scratch_operands = 0 : i64, tpu.core_type = #tpu.core_type<tc>, window_params = [{transform_indices = @transform_0, window_bounds = array<i64: 16, 1>}, {pipeline_mode = #tpu.pipeline_mode<synchronous>, transform_indices = @transform_1, window_bounds = array<i64: 512, 128>}, {transform_indices = @transform_2, window_bounds = array<i64: 16, 128>}]} {
    %c0 = arith.constant 0 : index
    %c0_0 = arith.constant 0 : index
    %0 = vector.load %arg1[%c0, %c0_0] : memref<16x1xi32, #tpu.memory_space<vmem>>, vector<16x1xi32>
    %1 = tpu.iota {dimensions = array<i32: 1>} : vector<16x512xi32>
    %2 = vector.broadcast %0 : vector<16x1xi32> to vector<16x512xi32>
    %3 = arith.cmpi eq, %1, %2 : vector<16x512xi32>
    %4 = arith.extui %3 : vector<16x512xi1> to vector<16x512xi32>
    %5 = arith.sitofp %4 : vector<16x512xi32> to vector<16x512xf32>
    %c0_1 = arith.constant 0 : index
    %c0_2 = arith.constant 0 : index
    %6 = vector.load %arg2[%c0_1, %c0_2] : memref<512x128xf32, #tpu.memory_space<vmem>>, vector<512x128xf32>
    %cst = arith.constant dense<0.000000e+00> : vector<16x128xf32>
    %7 = tpu.matmul %5, %6, %cst {dimension_numbers = #tpu.dot_dimension_numbers<[1], [0], [0], [1], [0, 0, 1, 1], [], []>} : vector<16x512xf32>, vector<512x128xf32>, vector<16x128xf32> -> vector<16x128xf32>
    %c0_3 = arith.constant 0 : index
    %c0_4 = arith.constant 0 : index
    %8 = vector.load %arg3[%c0_3, %c0_4] : memref<16x128xf32, #tpu.memory_space<vmem>>, vector<16x128xf32>
    tpu.vector_store %arg3[%c0_3, %c0_4], %7 {strides = array<i32>} : memref<16x128xf32, #tpu.memory_space<vmem>>, vector<16x128xf32>,
    return
  }
  func.func @transform_0(%arg0: i32) -> (i32, i32) {
    %c0_i32 = arith.constant 0 : i32
    %c0_i32_0 = arith.constant 0 : i32
    return %arg0, %c0_i32 : i32, i32
  }
  func.func @transform_1(%arg0: i32) -> (i32, i32) {
    %c0_i32 = arith.constant 0 : i32
    %c0_i32_0 = arith.constant 0 : i32
    %c0_i32_1 = arith.constant 0 : i32
    return %c0_i32, %c0_i32_0 : i32, i32
  }
  func.func @transform_2(%arg0: i32) -> (i32, i32) {
    %c0_i32 = arith.constant 0 : i32
    %c0_i32_0 = arith.constant 0 : i32
    return %arg0, %c0_i32 : i32, i32
  }
}

</mosaic_0001>

<bundles_post_ra>
// kernel: positional_embedder_forward.1
= control target key start
LH: loop header
LB: loop body
LE: loop exit
PB: predicated region body
PF: predicated region fallthrough
CT: control target
= control target key end

     0   :  { %7 = vsyncpa [#allocation3], 0  ;;  %s749_s0 = inlined_call_operand.vmem [shape: s32[32,1], index: 0, kind: input, shape index: {}]   ;;  %s750_s1 = inlined_call_operand.hbm [shape: f32[512,128], index: 1, kind: input, shape index: {}]   ;;  %s751_s2 = inlined_call_operand.hbm [shape: f32[32,128], index: 2, kind: output, shape index: {}]  }
   0x1   :  { %8 = vsyncpa [#allocation4], 0 }
   0x2   :  { %10 = vsyncpa [#allocation4 + $0x1], 0  ;;  %s655_s9 = smov 0   ;;  %s657_s10 = smov 0  }
   0x3   :  { %s659_s11 = smov 0   ;;  %s661_s12 = smov 0  }
   0x4 LB: > { %s676_s13 = sadd.s32 4294967295, %s631_s12   ;;  %s447_s14 = sadd.s32 4294967294, %s631_s12   ;;  %s631_s12 = sphi %s661_s12, %s757_s12   ;;  %s627_s11 = sphi %s659_s11, %s756_s11   ;;  %s623_s10 = sphi %s657_s10, %s755_s10   ;;  %s619_s9 = sphi %s655_s9, %s754_s9  }
   0x5   : > { %s680_s15 = sadd.s32 1, %s631_s12   ;;  %s70_s16 = sadd.s32 1, %s627_s11 }
   0x6   : > { %s67_s17 = ssub.s32 %s631_s12, %s680_s15  ;;  %p80_p0 = scmp.ne.s32.totalorder %s627_s11, %s623_s10 }
   0x7   : > { %p68_p1 = scmp.eq.s32.totalorder %s67_s17, 0  ;;  %p81_p2 = scmp.eq.s32.totalorder %s676_s13, 1 }
   0x8   : > { %p86_p3 = scmp.ne.s32.totalorder %s623_s10, %s619_s9  ;;  %p87_p4 = scmp.eq.s32.totalorder %s447_s14, 1 }
   0x9   : > { %s691_s18 = scalar_select %p68_p1, %s627_s11, %s70_s16  }
   0xa   : > { %p693_p5 = por %p81_p2, %p80_p0  ;;  %p697_p6 = por %p87_p4, %p86_p3 }
   0xb   : > { %p448_p7 = scmp.ge.s32.totalorder %s631_s12, 1  ;;  %p94_p8 = scmp.lt.s32.totalorder %s631_s12, 3 }
   0xc   : > { %p492_p9 = scmp.eq.s32.totalorder %s676_s13, 0  ;;  %s105_s23 = sshll.u32 %s750_s1, 4  ;;  %s106_s23 = int_to_ptr.hbm [resolvable:$true] %s105_s23 }
   0xd   : > { %p95_p10 = pnand %p448_p7, %p94_p8  ;;  %s633_s24 = smov [#allocation2]  }
   0xe   : > { %s107_s25 = sshll.u32 %s633_s24, 4  ;;  %s634_s26 = smov 128   ;;  %s108_s25 = int_to_ptr.vmem [resolvable:$true] %s107_s25 }
   0xf   : > { %p484_p11 = pneg %p95_p10  ;;  %s635_s27 = smov 8  }
  0x10   : > { %132 = sbr.rel (%p95_p10) target bundleno = 294 (0x126), region = 28 }
  0x11   : > { %p485_p12 = pnand %p492_p9, %p484_p11 }
  0x13   : > { %487 = dma.hbm_to_vmem [thread:$0]  (!%p485_p12), %s106_s23, 8192, %s108_s25, [#allocation3], %s634_s26, %s634_s26, %s635_s27  }
  0x15   : > { %610 = dma.done.wait (%p492_p9), [#allocation3], 8192  }
  0x16   : > { %612 = vsyncadd (%p492_p9), [#allocation3], 4294959104  ;;  %s454_s28 = sshll.u32 %s676_s13, 1  ;;  %v636_v0 = vmov 0   ;;  %v214_v2 = vld [vmem:[#allocation2 + $0x78] sm:$0xff]  ;;  %v213_v6 = vld [vmem:[#allocation2 + $0x70] sm:$0xff] }
  0x17   : > { %534 = vset.pattern.permute.xlu0 %v636_v0  ;;  %p156_p13 = scmp.lt.s32.totalorder %s454_s28, 3  ;;  %263 = vmatpush.msra.mxu0 %v214_v2  ;;  %v230_v3 = vld [vmem:[#allocation2 + $0xf8] sm:$0xff]  ;;  %v229_v7 = vld [vmem:[#allocation2 + $0xf0] sm:$0xff]  ;;  %v212_v10 = vld [vmem:[#allocation2 + $0x68] sm:$0xff]  ;;  %s152_s5 = sand.u32 1, %s623_s10  }
  0x18   : > { %v246_v4 = vld [vmem:[#allocation2 + $0x178] sm:$0xff]  ;;  %286 = vmatpush.msra.mxu1 %v230_v3  ;;  %v245_v8 = vld [vmem:[#allocation2 + $0x170] sm:$0xff]  ;;  %v228_v11 = vld [vmem:[#allocation2 + $0xe8] sm:$0xff]  ;;  %v164_v3 = vlaneseq  ;;  %s453_s6 = sshll.u32 %s152_s5, 4  ;;  %s477_s7 = sshll.u32 %s676_s13, 4 }
  0x19   : > { %s759_s28 = smov (!%p156_p13, %s454_s28), 3  ;;  %v262_v5 = vld [vmem:[#allocation2 + $0x1f8] sm:$0xff]  ;;  %309 = vmatpush.msra.mxu2 %v246_v4  ;;  %264 = vmatpush.msra.mxu0 %v213_v6  ;;  %v261_v9 = vld [vmem:[#allocation2 + $0x1f0] sm:$0xff]  ;;  %v244_v12 = vld [vmem:[#allocation2 + $0x168] sm:$0xff]  ;;  %s369_s16 = scalar_lea.hbm %s751_s2, %s477_s7 }
  0x1a   : > { %s455_s29 = sshll.u32 %s759_s28, 3  ;;  %332 = vmatpush.msra.mxu3 %v262_v5  ;;  %287 = vmatpush.msra.mxu1 %v229_v7  ;;  %v260_v13 = vld [vmem:[#allocation2 + $0x1e8] sm:$0xff]  ;;  %v211_v14 = vld [vmem:[#allocation2 + $0x60] sm:$0xff]  ;;  %v210_v19 = vld [vmem:[#allocation2 + $0x58] sm:$0xff]  ;;  %v165_v4 = vand.u32 127, %v164_v3  ;;  %s154_s17 = scalar_lea.vmem [#allocation5], %s453_s6 }
  0x1b   : > { %s159_s4 = scalar_lea.vmem %s749_s0, %s455_s29  ;;  %310 = vmatpush.msra.mxu2 %v245_v8  ;;  %265 = vmatpush.msra.mxu0 %v212_v10  ;;  %v227_v15 = vld [vmem:[#allocation2 + $0xe0] sm:$0xff]  ;;  %v226_v20 = vld [vmem:[#allocation2 + $0xd8] sm:$0xff]  ;;  %v209_v23 = vld [vmem:[#allocation2 + $0x50] sm:$0xff]  ;;  %s370_s21 = sshll.u32 %s154_s17, 4  ;;  %s371_s21 = int_to_ptr.vmem [resolvable:$true] %s370_s21 }
  0x1c   : > { %v162_v1 = vld [vmem:[%s159_s4] sm:$0xff]  ;;  %333 = vmatpush.msra.mxu3 %v261_v9  ;;  %v163_v17 = vld [vmem:[%s159_s4 + $0x8] sm:$0xff]  ;;  %288 = vmatpush.msra.mxu1 %v228_v11  ;;  %v242_v21 = vld [vmem:[#allocation2 + $0x158] sm:$0xff]  ;;  %v166_v5 = vadd.s32 128, %v165_v4  ;;  %v167_v6 = vadd.s32 256, %v165_v4  ;;  %v168_v7 = vadd.s32 384, %v165_v4 }
  0x1d   : > { %170 = vperm.xlu0 %534, %v162_v1   ;;  %v243_v16 = vld [vmem:[#allocation2 + $0x160] sm:$0xff]  ;;  %311 = vmatpush.msra.mxu2 %v244_v12  ;;  %v258_v22 = vld [vmem:[#allocation2 + $0x1d8] sm:$0xff]  ;;  %v225_v24 = vld [vmem:[#allocation2 + $0xd0] sm:$0xff]  ;;  %v637_v9 = vmov 1.0   ;;  %s372_s22 = sshll.u32 %s369_s16, 4  ;;  %s358_s13 = scalar_lea.sflag [#allocation4], %s152_s5  ;;  %s373_s22 = int_to_ptr.hbm [resolvable:$true] %s372_s22 }
  0x1e   : > { %v259_v18 = vld [vmem:[#allocation2 + $0x1e0] sm:$0xff]  ;;  %334 = vmatpush.msra.mxu3 %v260_v13  ;;  %266 = vmatpush.msra.mxu0 %v211_v14  ;;  %v241_v25 = vld [vmem:[#allocation2 + $0x150] sm:$0xff]  ;;  %v208_v27 = vld [vmem:[#allocation2 + $0x48] sm:$0xff]  ;;  %s579_s23 = sshra.s32 %s373_s22, 4  ;;  %s585_s27 = scalar_lea.hbm %s751_s2, 32  ;;  %s580_s23 = int_to_ptr.hbm [resolvable:$true] %s579_s23 }
  0x1f   : > { %289 = vmatpush.msra.mxu1 %v227_v15  ;;  %312 = vmatpush.msra.mxu2 %v243_v16  ;;  %v257_v26 = vld [vmem:[#allocation2 + $0x1d0] sm:$0xff]  ;;  %v224_v28 = vld [vmem:[#allocation2 + $0xc8] sm:$0xff]  ;;  %v207_v31 = vld [vmem:[#allocation2 + $0x40] sm:$0xff]  ;;  %s581_s24 = scalar_lea.hbm %s580_s23, 16  ;;  %p586_p3 = scmp.lt.s32.totalorder %s580_s23, %s751_s2 }
  0x20   : > { %335 = vmatpush.msra.mxu3 %v259_v18  ;;  %267 = vmatpush.msra.mxu0 %v210_v19  ;;  %v240_v29 = vld [vmem:[#allocation2 + $0x148] sm:$0xff]  ;;  %v223_v32 = vld [vmem:[#allocation2 + $0xc0] sm:$0xff]  ;;  %v206_v35 = vld [vmem:[#allocation2 + $0x38] sm:$0xff]  ;;  %p582_p0 = scmp.ne.s32.totalorder %s580_s23, %s581_s24  ;;  %p587_p4 = scmp.lt.s32.totalorder %s585_s27, %s581_s24 }
  0x21   : > { %290 = vmatpush.msra.mxu1 %v226_v20  ;;  %313 = vmatpush.msra.mxu2 %v242_v21  ;;  %v256_v30 = vld [vmem:[#allocation2 + $0x1c8] sm:$0xff]  ;;  %v239_v33 = vld [vmem:[#allocation2 + $0x140] sm:$0xff]  ;;  %v222_v36 = vld [vmem:[#allocation2 + $0xb8] sm:$0xff] }
  0x22   : > { %336 = vmatpush.msra.mxu3 %v258_v22  ;;  %268 = vmatpush.msra.mxu0 %v209_v23  ;;  %v255_v34 = vld [vmem:[#allocation2 + $0x1c0] sm:$0xff]  ;;  %v238_v37 = vld [vmem:[#allocation2 + $0x138] sm:$0xff]  ;;  %v205_v39 = vld [vmem:[#allocation2 + $0x30] sm:$0xff]  ;;  %p583_p1 = pnand %p582_p0, %p693_p5  ;;  %p588_p7 = por %p587_p4, %p586_p3 }
  0x23   : > { %291 = vmatpush.msra.mxu1 %v225_v24  ;;  %314 = vmatpush.msra.mxu2 %v241_v25  ;;  %v254_v38 = vld [vmem:[#allocation2 + $0x1b8] sm:$0xff]  ;;  %v221_v40 = vld [vmem:[#allocation2 + $0xb0] sm:$0xff]  ;;  %v204_v43 = vld [vmem:[#allocation2 + $0x28] sm:$0xff] }
  0x24   : > { %337 = vmatpush.msra.mxu3 %v257_v26  ;;  %269 = vmatpush.msra.mxu0 %v208_v27  ;;  %v237_v41 = vld [vmem:[#allocation2 + $0x130] sm:$0xff]  ;;  %v220_v44 = vld [vmem:[#allocation2 + $0xa8] sm:$0xff]  ;;  %v203_v47 = vld [vmem:[#allocation2 + $0x20] sm:$0xff]  ;;  %p584_p2 = pneg %p583_p1 }
  0x25   : > { %173 = vperm.xlu0 %534, %v163_v17   ;;  %292 = vmatpush.msra.mxu1 %v224_v28  ;;  %v253_v42 = vld [vmem:[#allocation2 + $0x1b0] sm:$0xff]  ;;  %v236_v45 = vld [vmem:[#allocation2 + $0x128] sm:$0xff]  ;;  %v219_v48 = vld [vmem:[#allocation2 + $0xa0] sm:$0xff] }
  0x26   : > { %315 = vmatpush.msra.mxu2 %v240_v29  ;;  %338 = vmatpush.msra.mxu3 %v256_v30  ;;  %v252_v46 = vld [vmem:[#allocation2 + $0x1a8] sm:$0xff]  ;;  %v235_v49 = vld [vmem:[#allocation2 + $0x120] sm:$0xff]  ;;  %v202_v51 = vld [vmem:[#allocation2 + $0x18] sm:$0xff]  ;;  %p589_p8 = pnand %p588_p7, %p584_p2 }
  0x27   : > { %270 = vmatpush.msra.mxu0 %v207_v31  ;;  %293 = vmatpush.msra.mxu1 %v223_v32  ;;  %v251_v50 = vld [vmem:[#allocation2 + $0x1a0] sm:$0xff]  ;;  %v218_v52 = vld [vmem:[#allocation2 + $0x98] sm:$0xff]  ;;  %v201_v55 = vld [vmem:[#allocation2 + $0x10] sm:$0xff] }
  0x28   : > { %316 = vmatpush.msra.mxu2 %v239_v33  ;;  %339 = vmatpush.msra.mxu3 %v255_v34  ;;  %v234_v53 = vld [vmem:[#allocation2 + $0x118] sm:$0xff]  ;;  %v217_v56 = vld [vmem:[#allocation2 + $0x90] sm:$0xff]  ;;  %v200_v59 = vld [vmem:[#allocation2 + $0x8] sm:$0xff] }
  0x29   : > { %271 = vmatpush.msra.mxu0 %v206_v35  ;;  %294 = vmatpush.msra.mxu1 %v222_v36  ;;  %v250_v54 = vld [vmem:[#allocation2 + $0x198] sm:$0xff]  ;;  %v233_v57 = vld [vmem:[#allocation2 + $0x110] sm:$0xff]  ;;  %v216_v60 = vld [vmem:[#allocation2 + $0x88] sm:$0xff] }
  0x2a   : > { %317 = vmatpush.msra.mxu2 %v238_v37  ;;  %340 = vmatpush.msra.mxu3 %v254_v38  ;;  %v249_v58 = vld [vmem:[#allocation2 + $0x190] sm:$0xff]  ;;  %v232_v61 = vld [vmem:[#allocation2 + $0x108] sm:$0xff]  ;;  %v199_v63 = vld [vmem:[#allocation2] sm:$0xff] }
  0x2b   : > { %272 = vmatpush.msra.mxu0 %v205_v39  ;;  %295 = vmatpush.msra.mxu1 %v221_v40  ;;  %v248_v62 = vld [vmem:[#allocation2 + $0x188] sm:$0xff]  ;;  %v215_v0 = vld [vmem:[#allocation2 + $0x80] sm:$0xff] }
  0x2c   : > { %318 = vmatpush.msra.mxu2 %v237_v41  ;;  %341 = vmatpush.msra.mxu3 %v253_v42  ;;  %v231_v1 = vld [vmem:[#allocation2 + $0x100] sm:$0xff] }
  0x2d   : > { %273 = vmatpush.msra.mxu0 %v204_v43  ;;  %296 = vmatpush.msra.mxu1 %v220_v44  ;;  %v247_v2 = vld [vmem:[#allocation2 + $0x180] sm:$0xff] }
  0x2e   : > { %319 = vmatpush.msra.mxu2 %v236_v45  ;;  %342 = vmatpush.msra.mxu3 %v252_v46 }
  0x2f   : > { %274 = vmatpush.msra.mxu0 %v203_v47  ;;  %297 = vmatpush.msra.mxu1 %v219_v48 }
  0x30   : > { %320 = vmatpush.msra.mxu2 %v235_v49  ;;  %343 = vmatpush.msra.mxu3 %v251_v50 }
  0x31   : > { %275 = vmatpush.msra.mxu0 %v202_v51  ;;  %298 = vmatpush.msra.mxu1 %v218_v52 }
  0x32   : > { %321 = vmatpush.msra.mxu2 %v234_v53  ;;  %344 = vmatpush.msra.mxu3 %v250_v54 }
  0x33   : > { %276 = vmatpush.msra.mxu0 %v201_v55  ;;  %299 = vmatpush.msra.mxu1 %v217_v56 }
  0x34   : > { %322 = vmatpush.msra.mxu2 %v233_v57  ;;  %345 = vmatpush.msra.mxu3 %v249_v58 }
  0x35   : > { %277 = vmatpush.msra.mxu0 %v200_v59  ;;  %300 = vmatpush.msra.mxu1 %v216_v60 }
  0x36   : > { %323 = vmatpush.msra.mxu2 %v232_v61  ;;  %346 = vmatpush.msra.mxu3 %v248_v62 }
  0x37   : > { %278 = vmatpush.msra.mxu0 %v199_v63  ;;  %301 = vmatpush.msra.mxu1 %v215_v0 }
  0x38   : > { %324 = vmatpush.msra.mxu2 %v231_v1  ;;  %347 = vmatpush.msra.mxu3 %v247_v2 }
  0x8f   : > { %v171_v8 = vpop.permute.xlu0 %170 }
  0x90   : > { %vm175_vm0 = vcmp.eq.s32.totalorder %v165_v4, %v171_v8  ;;  %vm176_vm1 = vcmp.eq.s32.totalorder %v166_v5, %v171_v8  ;;  %vm177_vm2 = vcmp.eq.s32.totalorder %v167_v6, %v171_v8  ;;  %vm178_vm3 = vcmp.eq.s32.totalorder %v168_v7, %v171_v8 }
  0x91   : > { %464 = vmatmul.msk.f32.vlgmr.msra.gmra.mxu0 %vm175_vm0, %v637_v9  ;;  %466 = vmatmul.msk.f32.vlgmr.msra.gmra.mxu1 %vm176_vm1, %v637_v9 }
  0x92   : > { %468 = vmatmul.msk.f32.vlgmr.msra.gmra.mxu2 %vm177_vm2, %v637_v9  ;;  %470 = vmatmul.msk.f32.vlgmr.msra.gmra.mxu3 %vm178_vm3, %v637_v9 }
  0x97   : > { %v174_v10 = vpop.permute.xlu0 %173 }
  0x98   : > { %vm179_vm4 = vcmp.eq.s32.totalorder %v165_v4, %v174_v10  ;;  %vm180_vm5 = vcmp.eq.s32.totalorder %v166_v5, %v174_v10  ;;  %vm181_vm6 = vcmp.eq.s32.totalorder %v167_v6, %v174_v10  ;;  %vm182_vm7 = vcmp.eq.s32.totalorder %v168_v7, %v174_v10 }
  0x99   : > { %465 = vmatmul.msk.f32.gmra.mxu0 %vm179_vm4, %v637_v9  ;;  %467 = vmatmul.msk.f32.gmra.mxu1 %vm180_vm5, %v637_v9 }
  0x9a   : > { %469 = vmatmul.msk.f32.gmra.mxu2 %vm181_vm6, %v637_v9  ;;  %471 = vmatmul.msk.f32.gmra.mxu3 %vm182_vm7, %v637_v9 }
 0x10e   : > { %v280_v11 = vpop.f32.mrf.mxu0  ;;  %v303_v12 = vpop.f32.mrf.mxu1 }
 0x10f   : > { %v304_v13 = vadd.f32 %v303_v12, %v280_v11 }
 0x115   : > { %v326_v14 = vpop.f32.mrf.mxu2  ;;  %v349_v15 = vpop.f32.mrf.mxu3 }
 0x116   : > { %v327_v16 = vadd.f32 %v326_v14, %v304_v13  ;;  %v283_v18 = vpop.f32.mrf.mxu0  ;;  %v306_v19 = vpop.f32.mrf.mxu1 }
 0x117   : > { %v307_v20 = vadd.f32 %v306_v19, %v283_v18 }
 0x118   : > { %v350_v17 = vadd.f32 %v349_v15, %v327_v16 }
 0x11a   : > { %355 = vst [vmem:[%s154_s17] sm:$0xff] %v350_v17 }
 0x11d   : > { %v329_v21 = vpop.f32.mrf.mxu2  ;;  %v352_v23 = vpop.f32.mrf.mxu3 }
 0x11e   : > { %v330_v22 = vadd.f32 %v329_v21, %v307_v20 }
 0x120   : > { %v353_v24 = vadd.f32 %v352_v23, %v330_v22 }
 0x122   : > { %356 = vst [vmem:[%s154_s17 + $0x8] sm:$0xff] %v353_v24 }
 0x123   : > { %592 = shalt.err (!%p589_p8)
}
 0x124   : > { %s638_s30 = smov 128   ;;  %s639_s3 = smov 8  }
 0x125   : > { %482 = dma.vmem_to_hbm [thread:$0]  (%p693_p5), %s371_s21, 256, %s373_s22, %s358_s13, %s638_s30, %s638_s30, %s639_s3  }
 0x126 PF: > { %p494_p9 = scmp.ge.s32.totalorder %s631_s12, 2  ;;  %s387_s4 = sand.u32 1, %s619_s9  }
 0x127   : > { %s388_s5 = scalar_lea.sflag [#allocation4], %s387_s4 }
 0x128   : > { %p489_p10 = pnand %p494_p9, %p697_p6 }
 0x12a   : > { %p490_p11 = pneg %p489_p10 }
 0x12c   : > { %614 = dma.done.wait (%p490_p11), %s388_s5, 256  }
 0x12d   : > { %616 = vsyncadd (%p490_p11), %s388_s5, 4294967040  ;;  %p13_p12 = scmp.ge.s32.totalorder %s680_s15, 4   ;;  %s754_s9 = smov %s623_s10 }
 0x12e   : > { %s755_s10 = smov %s627_s11  ;;  %s756_s11 = smov %s691_s18 }
 0x12f   : > { %s757_s12 = smov %s680_s15  ;;  %15 = sbr.rel (!%p13_p12) target bundleno = 4 (0x4), region = 68 }
 0x134   :  { %394 = vsyncpa [#allocation3], 1 }
 0x135   :  { %396 = vsyncpa [#allocation3 + $0x1], 1 }
 0x136   :  { %397 = vsyncpa [#allocation4], 1 }
 0x137   :  { %399 = vsyncpa [#allocation4 + $0x1], 1 }

</bundles_post_ra>
